<compile_context>
chip_gen: v5e
topology: v5e:2x2
jax: 0.10.0
libtpu: 0.0.40
codegen_flags: <defaults>
</compile_context>

<pallas_src>
import functools
import math

import jax
import jax.numpy as jnp
import numpy as np
from jax import lax
from jax.experimental import pallas as pl
from jax.experimental.pallas import tpu as pltpu

# ----------------------------- config (small) -----------------------------
B = 2            # batch
S = 8            # sequence length
H = 32           # hidden_size
NH = 4           # num_attention_heads
DH = H // NH     # attention_head_size
I = 64           # intermediate_size
EPS = 1e-12      # layer_norm_eps
DTYPE = jnp.float32


def _layer_norm(x, gamma, beta, eps):
    # PyTorch nn.LayerNorm over last dim, biased variance
    mean = jnp.mean(x, axis=-1, keepdims=True)
    var = jnp.mean((x - mean) ** 2, axis=-1, keepdims=True)
    return (x - mean) * lax.rsqrt(var + eps) * gamma + beta


def _gelu_exact(x):
    # HF ACT2FN["gelu"] (exact, erf-based)
    return 0.5 * x * (1.0 + lax.erf(x * (1.0 / math.sqrt(2.0))))


def roberta_layer_kernel(
    x_ref, mask_ref, wqkv_ref, bqkv_ref, wo_ref, wi_ref, bi_ref, w2_ref, vec_ref,
    out_ref, *, batch, seq, hidden, num_heads, head_dim, eps,
):
    x = x_ref[...]            # (B*S, H)
    mask = mask_ref[...]      # (B, 1, S) additive mask, broadcast over heads & queries

    # ---- fused QKV projection: one (B*S, H) x (H, 3H) MXU matmul ----
    qkv = jnp.dot(x, wqkv_ref[...], preferred_element_type=jnp.float32) + bqkv_ref[...]
    q = qkv[:, :hidden]
    k = qkv[:, hidden:2 * hidden]
    v = qkv[:, 2 * hidden:]

    # packed small params: rows = [bo, ln1_g, ln1_b, b2, ln2_g, ln2_b]
    vp = vec_ref[...]         # (6, H)
    bo, ln1_g, ln1_b = vp[0:1], vp[1:2], vp[2:3]
    b2, ln2_g, ln2_b = vp[3:4], vp[4:5], vp[5:6]

    wo = wo_ref[...]          # (H, H)
    scale = 1.0 / math.sqrt(head_dim)

    # ---- per-head scaled dot-product attention, batched over the batch dim.
    # Head merge is folded into the Wo projection (accumulate per-head slices),
    # so no lane-dim concatenate is needed.
    attn_dense = None
    for h in range(num_heads):            # static loop, NH=4
        lo = h * head_dim
        qh = q[:, lo:lo + head_dim].reshape(batch, seq, head_dim)   # (B, S, DH)
        kh = k[:, lo:lo + head_dim].reshape(batch, seq, head_dim)
        vh = v[:, lo:lo + head_dim].reshape(batch, seq, head_dim)

        s = jnp.einsum("bqd,bkd->bqk", qh, kh,
                       preferred_element_type=jnp.float32)          # (B, S, S)
        s = s * scale + mask
        s = s - jnp.max(s, axis=-1, keepdims=True)
        ex = jnp.exp(s)
        inv = pl.reciprocal(jnp.sum(ex, axis=-1, keepdims=True), approx=True)  # EUP
        probs = ex * inv
        ctx = jnp.einsum("bqk,bkd->bqd", probs, vh,
                         preferred_element_type=jnp.float32)        # (B, S, DH)
        part = jnp.dot(ctx.reshape(batch * seq, head_dim), wo[lo:lo + head_dim, :],
                       preferred_element_type=jnp.float32)
        attn_dense = part if attn_dense is None else attn_dense + part

    # ---- RobertaSelfOutput: dense bias + residual + LayerNorm ----
    attn_out = _layer_norm(attn_dense + bo + x, ln1_g, ln1_b, eps)

    # ---- RobertaIntermediate: dense + exact GELU ----
    inter = jnp.dot(attn_out, wi_ref[...], preferred_element_type=jnp.float32) + bi_ref[...]
    inter = _gelu_exact(inter)

    # ---- RobertaOutput: dense + residual + LayerNorm ----
    ffn = jnp.dot(inter, w2_ref[...], preferred_element_type=jnp.float32) + b2
    out_ref[...] = _layer_norm(ffn + attn_out, ln2_g, ln2_b, eps).astype(out_ref.dtype)


@jax.jit
def roberta_layer_forward(x, mask, params):
    """x: (B,S,H) f32, mask: (B,1,S) additive f32, params: dict of weights."""
    Bsz, Seq, Hid = x.shape
    head_dim = Hid // NH

    # Wrapper-side packing (one-time parameter prep; fused by XLA under jit).
    x2 = x.reshape(Bsz * Seq, Hid)
    wqkv = jnp.concatenate([params["wq"], params["wk"], params["wv"]], axis=1)   # (H, 3H)
    bqkv = jnp.concatenate([params["bq"], params["bk"], params["bv"]], axis=1)   # (1, 3H)
    vec = jnp.concatenate(
        [params["bo"], params["ln1_g"], params["ln1_b"],
         params["b2"], params["ln2_g"], params["ln2_b"]], axis=0)                # (6, H)

    kernel = functools.partial(
        roberta_layer_kernel, batch=Bsz, seq=Seq, hidden=Hid,
        num_heads=NH, head_dim=head_dim, eps=EPS)

    def vmem():
        return pl.BlockSpec(memory_space=pltpu.MemorySpace.VMEM)

    # Single invocation: no grid, every operand is a whole-array VMEM resident.
    out2 = pl.pallas_call(
        kernel,
        out_shape=jax.ShapeDtypeStruct((Bsz * Seq, Hid), x.dtype),
        in_specs=[vmem() for _ in range(9)],
        out_specs=vmem(),
    )(x2, mask, wqkv, bqkv, params["wo"], params["wi"], params["bi"], params["w2"], vec)

    return out2.reshape(Bsz, Seq, Hid)


def roberta_layer_reference(x, mask, p):
    """Pure-JAX reference mirroring the PyTorch forward (eval mode)."""
    Bsz, Seq, Hid = x.shape
    q = x @ p["wq"] + p["bq"]
    k = x @ p["wk"] + p["bk"]
    v = x @ p["wv"] + p["bv"]

    def split(t):  # (B,S,H) -> (B,NH,S,DH)
        return t.reshape(Bsz, Seq, NH, DH).transpose(0, 2, 1, 3)

    qh, kh, vh = split(q), split(k), split(v)
    scores = jnp.einsum("bhqd,bhkd->bhqk", qh, kh) / math.sqrt(DH)
    scores = scores + mask[:, None, :, :]            # (B,1,1,S) semantics
    probs = jax.nn.softmax(scores, axis=-1)
    ctx = jnp.einsum("bhqk,bhkd->bhqd", probs, vh)
    ctx = ctx.transpose(0, 2, 1, 3).reshape(Bsz, Seq, Hid)

    def ln(t, g, b):
        mu = jnp.mean(t, axis=-1, keepdims=True)
        var = jnp.mean((t - mu) ** 2, axis=-1, keepdims=True)
        return (t - mu) / jnp.sqrt(var + EPS) * g + b

    attn_out = ln(ctx @ p["wo"] + p["bo"] + x, p["ln1_g"], p["ln1_b"])
    inter = attn_out @ p["wi"] + p["bi"]
    inter = 0.5 * inter * (1.0 + lax.erf(inter / math.sqrt(2.0)))
    ffn = inter @ p["w2"] + p["b2"]
    return ln(ffn + attn_out, p["ln2_g"], p["ln2_b"])


def init_params(key):
    ks = jax.random.split(key, 12)
    std = 0.02
    p = {
        "wq": jax.random.normal(ks[0], (H, H), DTYPE) * std,
        "bq": jax.random.normal(ks[1], (1, H), DTYPE) * std,
        "wk": jax.random.normal(ks[2], (H, H), DTYPE) * std,
        "bk": jax.random.normal(ks[3], (1, H), DTYPE) * std,
        "wv": jax.random.normal(ks[4], (H, H), DTYPE) * std,
        "bv": jax.random.normal(ks[5], (1, H), DTYPE) * std,
        "wo": jax.random.normal(ks[6], (H, H), DTYPE) * std,
        "bo": jax.random.normal(ks[7], (1, H), DTYPE) * std,
        "ln1_g": jnp.ones((1, H), DTYPE),
        "ln1_b": jnp.zeros((1, H), DTYPE),
        "wi": jax.random.normal(ks[8], (H, I), DTYPE) * std,
        "bi": jax.random.normal(ks[9], (1, I), DTYPE) * std,
        "w2": jax.random.normal(ks[10], (I, H), DTYPE) * std,
        "b2": jax.random.normal(ks[11], (1, H), DTYPE) * std,
        "ln2_g": jnp.ones((1, H), DTYPE),
        "ln2_b": jnp.zeros((1, H), DTYPE),
    }
    return p


if __name__ == "__main__":
    key = jax.random.PRNGKey(0)
    kx, kp = jax.random.split(key)

    x = jax.random.normal(kx, (B, S, H), DTYPE)
    # additive attention mask: last 2 positions of batch 1 masked out
    pad = jnp.zeros((B, 1, S), DTYPE)
    pad = pad.at[1, 0, S - 2:].set(-10000.0)

    params = init_params(kp)

    # TODO(synk): dropout (attention/hidden) is eval-mode identity; LoRA / adapters /
    # prefix-tuning / cross-attention / decoder KV-cache branches are config-disabled
    # in the reference module and therefore not implemented.

    out = roberta_layer_forward(x, pad, params)
    out = jax.block_until_ready(out)

    ref = roberta_layer_reference(x, pad, params)
    # Tolerance slightly relaxed vs. exact-f32 because the softmax denominator uses
    # the EUP approximate reciprocal (pl.reciprocal(..., approx=True)).
    np.testing.assert_allclose(np.asarray(out), np.asarray(ref), rtol=1e-3, atol=1e-4)

    print("KERNEL_OK")
</pallas_src>

<mosaic_0001>
module attributes {stable_mosaic.version = 11 : i64} {
  func.func @roberta_layer_kernel(%arg0: memref<16x32xf32, #tpu.memory_space<vmem>>, %arg1: memref<2x1x8xf32, #tpu.memory_space<vmem>>, %arg2: memref<32x96xf32, #tpu.memory_space<vmem>>, %arg3: memref<1x96xf32, #tpu.memory_space<vmem>>, %arg4: memref<32x32xf32, #tpu.memory_space<vmem>>, %arg5: memref<32x64xf32, #tpu.memory_space<vmem>>, %arg6: memref<1x64xf32, #tpu.memory_space<vmem>>, %arg7: memref<64x32xf32, #tpu.memory_space<vmem>>, %arg8: memref<6x32xf32, #tpu.memory_space<vmem>>, %arg9: memref<16x32xf32, #tpu.memory_space<vmem>>) attributes {dimension_semantics = [], scalar_prefetch = 0 : i64, scratch_operands = 0 : i64, tpu.core_type = #tpu.core_type<tc>} {
    %c0 = arith.constant 0 : index
    %c0_0 = arith.constant 0 : index
    %0 = vector.load %arg0[%c0, %c0_0] : memref<16x32xf32, #tpu.memory_space<vmem>>, vector<16x32xf32>
    %c0_1 = arith.constant 0 : index
    %c0_2 = arith.constant 0 : index
    %c0_3 = arith.constant 0 : index
    %1 = vector.load %arg1[%c0_1, %c0_2, %c0_3] : memref<2x1x8xf32, #tpu.memory_space<vmem>>, vector<2x1x8xf32>
    %c0_4 = arith.constant 0 : index
    %c0_5 = arith.constant 0 : index
    %2 = vector.load %arg2[%c0_4, %c0_5] : memref<32x96xf32, #tpu.memory_space<vmem>>, vector<32x96xf32>
    %cst = arith.constant dense<0.000000e+00> : vector<16x96xf32>
    %3 = tpu.matmul %0, %2, %cst {dimension_numbers = #tpu.dot_dimension_numbers<[1], [0], [0], [1], [0, 0, 1, 1], [], []>} : vector<16x32xf32>, vector<32x96xf32>, vector<16x96xf32> -> vector<16x96xf32>
    %c0_6 = arith.constant 0 : index
    %c0_7 = arith.constant 0 : index
    %4 = vector.load %arg3[%c0_6, %c0_7] : memref<1x96xf32, #tpu.memory_space<vmem>>, vector<1x96xf32>
    %5 = vector.broadcast %4 : vector<1x96xf32> to vector<16x96xf32>
    %6 = arith.addf %3, %5 : vector<16x96xf32>
    %7 = vector.extract_strided_slice %6 {offsets = [0, 0], sizes = [16, 32], strides = [1, 1]} : vector<16x96xf32> to vector<16x32xf32>
    %8 = vector.extract_strided_slice %6 {offsets = [0, 32], sizes = [16, 32], strides = [1, 1]} : vector<16x96xf32> to vector<16x32xf32>
    %9 = vector.extract_strided_slice %6 {offsets = [0, 64], sizes = [16, 32], strides = [1, 1]} : vector<16x96xf32> to vector<16x32xf32>
    %c0_8 = arith.constant 0 : index
    %c0_9 = arith.constant 0 : index
    %10 = vector.load %arg8[%c0_8, %c0_9] : memref<6x32xf32, #tpu.memory_space<vmem>>, vector<6x32xf32>
    %11 = vector.extract_strided_slice %10 {offsets = [0, 0], sizes = [1, 32], strides = [1, 1]} : vector<6x32xf32> to vector<1x32xf32>
    %12 = vector.extract_strided_slice %10 {offsets = [1, 0], sizes = [1, 32], strides = [1, 1]} : vector<6x32xf32> to vector<1x32xf32>
    %13 = vector.extract_strided_slice %10 {offsets = [2, 0], sizes = [1, 32], strides = [1, 1]} : vector<6x32xf32> to vector<1x32xf32>
    %14 = vector.extract_strided_slice %10 {offsets = [3, 0], sizes = [1, 32], strides = [1, 1]} : vector<6x32xf32> to vector<1x32xf32>
    %15 = vector.extract_strided_slice %10 {offsets = [4, 0], sizes = [1, 32], strides = [1, 1]} : vector<6x32xf32> to vector<1x32xf32>
    %16 = vector.extract_strided_slice %10 {offsets = [5, 0], sizes = [1, 32], strides = [1, 1]} : vector<6x32xf32> to vector<1x32xf32>
    %c0_10 = arith.constant 0 : index
    %c0_11 = arith.constant 0 : index
    %17 = vector.load %arg4[%c0_10, %c0_11] : memref<32x32xf32, #tpu.memory_space<vmem>>, vector<32x32xf32>
    %18 = vector.extract_strided_slice %7 {offsets = [0, 0], sizes = [16, 8], strides = [1, 1]} : vector<16x32xf32> to vector<16x8xf32>
    %19 = vector.shape_cast %18 : vector<16x8xf32> to vector<2x8x8xf32>
    %20 = vector.extract_strided_slice %8 {offsets = [0, 0], sizes = [16, 8], strides = [1, 1]} : vector<16x32xf32> to vector<16x8xf32>
    %21 = vector.shape_cast %20 : vector<16x8xf32> to vector<2x8x8xf32>
    %22 = vector.extract_strided_slice %9 {offsets = [0, 0], sizes = [16, 8], strides = [1, 1]} : vector<16x32xf32> to vector<16x8xf32>
    %23 = vector.shape_cast %22 : vector<16x8xf32> to vector<2x8x8xf32>
    "tpu.trace_start"() <{level = 10 : i32, message = "bqd,bkd->bqk"}> : () -> ()
    %cst_12 = arith.constant dense<0.000000e+00> : vector<2x8x8xf32>
    %24 = tpu.matmul %19, %21, %cst_12 {dimension_numbers = #tpu.dot_dimension_numbers<[2], [2], [1], [1], [0, 0, 0, 1, 1, 1], [0], [0]>} : vector<2x8x8xf32>, vector<2x8x8xf32>, vector<2x8x8xf32> -> vector<2x8x8xf32>
    "tpu.trace_stop"() : () -> ()
    %cst_13 = arith.constant 0.353553385 : f32
    %25 = vector.broadcast %cst_13 : f32 to vector<2x8x8xf32>
    %26 = arith.mulf %24, %25 : vector<2x8x8xf32>
    %27 = vector.broadcast %1 : vector<2x1x8xf32> to vector<2x8x8xf32>
    %28 = arith.addf %26, %27 : vector<2x8x8xf32>
    %cst_14 = arith.constant dense<0xFF800000> : vector<2x8xf32>
    %29 = vector.multi_reduction <maximumf>, %28, %cst_14 [2] : vector<2x8x8xf32> to vector<2x8xf32>
    %30 = vector.shape_cast %29 : vector<2x8xf32> to vector<2x8x1xf32>
    %31 = vector.broadcast %30 : vector<2x8x1xf32> to vector<2x8x8xf32>
    %32 = arith.subf %28, %31 : vector<2x8x8xf32>
    %33 = math.exp %32 : vector<2x8x8xf32>
    %cst_15 = arith.constant dense<0.000000e+00> : vector<2x8xf32>
    %34 = vector.multi_reduction <add>, %33, %cst_15 [2] : vector<2x8x8xf32> to vector<2x8xf32>
    %35 = vector.shape_cast %34 : vector<2x8xf32> to vector<2x8x1xf32>
    %36 = tpu.reciprocal %35 {approx = true} : vector<2x8x1xf32> -> vector<2x8x1xf32>
    %37 = vector.broadcast %36 : vector<2x8x1xf32> to vector<2x8x8xf32>
    %38 = arith.mulf %33, %37 : vector<2x8x8xf32>
    "tpu.trace_start"() <{level = 10 : i32, message = "bqk,bkd->bqd"}> : () -> ()
    %cst_16 = arith.constant dense<0.000000e+00> : vector<2x8x8xf32>
    %39 = tpu.matmul %38, %23, %cst_16 {dimension_numbers = #tpu.dot_dimension_numbers<[2], [1], [1], [2], [0, 0, 0, 1, 1, 2], [0], [0]>} : vector<2x8x8xf32>, vector<2x8x8xf32>, vector<2x8x8xf32> -> vector<2x8x8xf32>
    "tpu.trace_stop"() : () -> ()
    %40 = vector.shape_cast %39 : vector<2x8x8xf32> to vector<16x8xf32>
    %41 = vector.extract_strided_slice %17 {offsets = [0, 0], sizes = [8, 32], strides = [1, 1]} : vector<32x32xf32> to vector<8x32xf32>
    %cst_17 = arith.constant dense<0.000000e+00> : vector<16x32xf32>
    %42 = tpu.matmul %40, %41, %cst_17 {dimension_numbers = #tpu.dot_dimension_numbers<[1], [0], [0], [1], [0, 0, 1, 1], [], []>} : vector<16x8xf32>, vector<8x32xf32>, vector<16x32xf32> -> vector<16x32xf32>
    %43 = vector.extract_strided_slice %7 {offsets = [0, 8], sizes = [16, 8], strides = [1, 1]} : vector<16x32xf32> to vector<16x8xf32>
    %44 = vector.shape_cast %43 : vector<16x8xf32> to vector<2x8x8xf32>
    %45 = vector.extract_strided_slice %8 {offsets = [0, 8], sizes = [16, 8], strides = [1, 1]} : vector<16x32xf32> to vector<16x8xf32>
    %46 = vector.shape_cast %45 : vector<16x8xf32> to vector<2x8x8xf32>
    %47 = vector.extract_strided_slice %9 {offsets = [0, 8], sizes = [16, 8], strides = [1, 1]} : vector<16x32xf32> to vector<16x8xf32>
    %48 = vector.shape_cast %47 : vector<16x8xf32> to vector<2x8x8xf32>
    "tpu.trace_start"() <{level = 10 : i32, message = "bqd,bkd->bqk"}> : () -> ()
    %cst_18 = arith.constant dense<0.000000e+00> : vector<2x8x8xf32>
    %49 = tpu.matmul %44, %46, %cst_18 {dimension_numbers = #tpu.dot_dimension_numbers<[2], [2], [1], [1], [0, 0, 0, 1, 1, 1], [0], [0]>} : vector<2x8x8xf32>, vector<2x8x8xf32>, vector<2x8x8xf32> -> vector<2x8x8xf32>
    "tpu.trace_stop"() : () -> ()
    %cst_19 = arith.constant 0.353553385 : f32
    %50 = vector.broadcast %cst_19 : f32 to vector<2x8x8xf32>
    %51 = arith.mulf %49, %50 : vector<2x8x8xf32>
    %52 = vector.broadcast %1 : vector<2x1x8xf32> to vector<2x8x8xf32>
    %53 = arith.addf %51, %52 : vector<2x8x8xf32>
    %cst_20 = arith.constant dense<0xFF800000> : vector<2x8xf32>
    %54 = vector.multi_reduction <maximumf>, %53, %cst_20 [2] : vector<2x8x8xf32> to vector<2x8xf32>
    %55 = vector.shape_cast %54 : vector<2x8xf32> to vector<2x8x1xf32>
    %56 = vector.broadcast %55 : vector<2x8x1xf32> to vector<2x8x8xf32>
    %57 = arith.subf %53, %56 : vector<2x8x8xf32>
    %58 = math.exp %57 : vector<2x8x8xf32>
    %cst_21 = arith.constant dense<0.000000e+00> : vector<2x8xf32>
    %59 = vector.multi_reduction <add>, %58, %cst_21 [2] : vector<2x8x8xf32> to vector<2x8xf32>
    %60 = vector.shape_cast %59 : vector<2x8xf32> to vector<2x8x1xf32>
    %61 = tpu.reciprocal %60 {approx = true} : vector<2x8x1xf32> -> vector<2x8x1xf32>
    %62 = vector.broadcast %61 : vector<2x8x1xf32> to vector<2x8x8xf32>
    %63 = arith.mulf %58, %62 : vector<2x8x8xf32>
    "tpu.trace_start"() <{level = 10 : i32, message = "bqk,bkd->bqd"}> : () -> ()
    %cst_22 = arith.constant dense<0.000000e+00> : vector<2x8x8xf32>
    %64 = tpu.matmul %63, %48, %cst_22 {dimension_numbers = #tpu.dot_dimension_numbers<[2], [1], [1], [2], [0, 0, 0, 1, 1, 2], [0], [0]>} : vector<2x8x8xf32>, vector<2x8x8xf32>, vector<2x8x8xf32> -> vector<2x8x8xf32>
    "tpu.trace_stop"() : () -> ()
    %65 = vector.shape_cast %64 : vector<2x8x8xf32> to vector<16x8xf32>
    %66 = vector.extract_strided_slice %17 {offsets = [8, 0], sizes = [8, 32], strides = [1, 1]} : vector<32x32xf32> to vector<8x32xf32>
    %cst_23 = arith.constant dense<0.000000e+00> : vector<16x32xf32>
    %67 = tpu.matmul %65, %66, %cst_23 {dimension_numbers = #tpu.dot_dimension_numbers<[1], [0], [0], [1], [0, 0, 1, 1], [], []>} : vector<16x8xf32>, vector<8x32xf32>, vector<16x32xf32> -> vector<16x32xf32>
    %68 = arith.addf %42, %67 : vector<16x32xf32>
    %69 = vector.extract_strided_slice %7 {offsets = [0, 16], sizes = [16, 8], strides = [1, 1]} : vector<16x32xf32> to vector<16x8xf32>
    %70 = vector.shape_cast %69 : vector<16x8xf32> to vector<2x8x8xf32>
    %71 = vector.extract_strided_slice %8 {offsets = [0, 16], sizes = [16, 8], strides = [1, 1]} : vector<16x32xf32> to vector<16x8xf32>
    %72 = vector.shape_cast %71 : vector<16x8xf32> to vector<2x8x8xf32>
    %73 = vector.extract_strided_slice %9 {offsets = [0, 16], sizes = [16, 8], strides = [1, 1]} : vector<16x32xf32> to vector<16x8xf32>
    %74 = vector.shape_cast %73 : vector<16x8xf32> to vector<2x8x8xf32>
    "tpu.trace_start"() <{level = 10 : i32, message = "bqd,bkd->bqk"}> : () -> ()
    %cst_24 = arith.constant dense<0.000000e+00> : vector<2x8x8xf32>
    %75 = tpu.matmul %70, %72, %cst_24 {dimension_numbers = #tpu.dot_dimension_numbers<[2], [2], [1], [1], [0, 0, 0, 1, 1, 1], [0], [0]>} : vector<2x8x8xf32>, vector<2x8x8xf32>, vector<2x8x8xf32> -> vector<2x8x8xf32>
    "tpu.trace_stop"() : () -> ()
    %cst_25 = arith.constant 0.353553385 : f32
    %76 = vector.broadcast %cst_25 : f32 to vector<2x8x8xf32>
    %77 = arith.mulf %75, %76 : vector<2x8x8xf32>
    %78 = vector.broadcast %1 : vector<2x1x8xf32> to vector<2x8x8xf32>
    %79 = arith.addf %77, %78 : vector<2x8x8xf32>
    %cst_26 = arith.constant dense<0xFF800000> : vector<2x8xf32>
    %80 = vector.multi_reduction <maximumf>, %79, %cst_26 [2] : vector<2x8x8xf32> to vector<2x8xf32>
    %81 = vector.shape_cast %80 : vector<2x8xf32> to vector<2x8x1xf32>
    %82 = vector.broadcast %81 : vector<2x8x1xf32> to vector<2x8x8xf32>
    %83 = arith.subf %79, %82 : vector<2x8x8xf32>
    %84 = math.exp %83 : vector<2x8x8xf32>
    %cst_27 = arith.constant dense<0.000000e+00> : vector<2x8xf32>
    %85 = vector.multi_reduction <add>, %84, %cst_27 [2] : vector<2x8x8xf32> to vector<2x8xf32>
    %86 = vector.shape_cast %85 : vector<2x8xf32> to vector<2x8x1xf32>
    %87 = tpu.reciprocal %86 {approx = true} : vector<2x8x1xf32> -> vector<2x8x1xf32>
    %88 = vector.broadcast %87 : vector<2x8x1xf32> to vector<2x8x8xf32>
    %89 = arith.mulf %84, %88 : vector<2x8x8xf32>
    "tpu.trace_start"() <{level = 10 : i32, message = "bqk,bkd->bqd"}> : () -> ()
    %cst_28 = arith.constant dense<0.000000e+00> : vector<2x8x8xf32>
    %90 = tpu.matmul %89, %74, %cst_28 {dimension_numbers = #tpu.dot_dimension_numbers<[2], [1], [1], [2], [0, 0, 0, 1, 1, 2], [0], [0]>} : vector<2x8x8xf32>, vector<2x8x8xf32>, vector<2x8x8xf32> -> vector<2x8x8xf32>
    "tpu.trace_stop"() : () -> ()
    %91 = vector.shape_cast %90 : vector<2x8x8xf32> to vector<16x8xf32>
    %92 = vector.extract_strided_slice %17 {offsets = [16, 0], sizes = [8, 32], strides = [1, 1]} : vector<32x32xf32> to vector<8x32xf32>
    %cst_29 = arith.constant dense<0.000000e+00> : vector<16x32xf32>
    %93 = tpu.matmul %91, %92, %cst_29 {dimension_numbers = #tpu.dot_dimension_numbers<[1], [0], [0], [1], [0, 0, 1, 1], [], []>} : vector<16x8xf32>, vector<8x32xf32>, vector<16x32xf32> -> vector<16x32xf32>
    %94 = arith.addf %68, %93 : vector<16x32xf32>
    %95 = vector.extract_strided_slice %7 {offsets = [0, 24], sizes = [16, 8], strides = [1, 1]} : vector<16x32xf32> to vector<16x8xf32>
    %96 = vector.shape_cast %95 : vector<16x8xf32> to vector<2x8x8xf32>
    %97 = vector.extract_strided_slice %8 {offsets = [0, 24], sizes = [16, 8], strides = [1, 1]} : vector<16x32xf32> to vector<16x8xf32>
    %98 = vector.shape_cast %97 : vector<16x8xf32> to vector<2x8x8xf32>
    %99 = vector.extract_strided_slice %9 {offsets = [0, 24], sizes = [16, 8], strides = [1, 1]} : vector<16x32xf32> to vector<16x8xf32>
    %100 = vector.shape_cast %99 : vector<16x8xf32> to vector<2x8x8xf32>
    "tpu.trace_start"() <{level = 10 : i32, message = "bqd,bkd->bqk"}> : () -> ()
    %cst_30 = arith.constant dense<0.000000e+00> : vector<2x8x8xf32>
    %101 = tpu.matmul %96, %98, %cst_30 {dimension_numbers = #tpu.dot_dimension_numbers<[2], [2], [1], [1], [0, 0, 0, 1, 1, 1], [0], [0]>} : vector<2x8x8xf32>, vector<2x8x8xf32>, vector<2x8x8xf32> -> vector<2x8x8xf32>
    "tpu.trace_stop"() : () -> ()
    %cst_31 = arith.constant 0.353553385 : f32
    %102 = vector.broadcast %cst_31 : f32 to vector<2x8x8xf32>
    %103 = arith.mulf %101, %102 : vector<2x8x8xf32>
    %104 = vector.broadcast %1 : vector<2x1x8xf32> to vector<2x8x8xf32>
    %105 = arith.addf %103, %104 : vector<2x8x8xf32>
    %cst_32 = arith.constant dense<0xFF800000> : vector<2x8xf32>
    %106 = vector.multi_reduction <maximumf>, %105, %cst_32 [2] : vector<2x8x8xf32> to vector<2x8xf32>
    %107 = vector.shape_cast %106 : vector<2x8xf32> to vector<2x8x1xf32>
    %108 = vector.broadcast %107 : vector<2x8x1xf32> to vector<2x8x8xf32>
    %109 = arith.subf %105, %108 : vector<2x8x8xf32>
    %110 = math.exp %109 : vector<2x8x8xf32>
    %cst_33 = arith.constant dense<0.000000e+00> : vector<2x8xf32>
    %111 = vector.multi_reduction <add>, %110, %cst_33 [2] : vector<2x8x8xf32> to vector<2x8xf32>
    %112 = vector.shape_cast %111 : vector<2x8xf32> to vector<2x8x1xf32>
    %113 = tpu.reciprocal %112 {approx = true} : vector<2x8x1xf32> -> vector<2x8x1xf32>
    %114 = vector.broadcast %113 : vector<2x8x1xf32> to vector<2x8x8xf32>
    %115 = arith.mulf %110, %114 : vector<2x8x8xf32>
    "tpu.trace_start"() <{level = 10 : i32, message = "bqk,bkd->bqd"}> : () -> ()
    %cst_34 = arith.constant dense<0.000000e+00> : vector<2x8x8xf32>
    %116 = tpu.matmul %115, %100, %cst_34 {dimension_numbers = #tpu.dot_dimension_numbers<[2], [1], [1], [2], [0, 0, 0, 1, 1, 2], [0], [0]>} : vector<2x8x8xf32>, vector<2x8x8xf32>, vector<2x8x8xf32> -> vector<2x8x8xf32>
    "tpu.trace_stop"() : () -> ()
    %117 = vector.shape_cast %116 : vector<2x8x8xf32> to vector<16x8xf32>
    %118 = vector.extract_strided_slice %17 {offsets = [24, 0], sizes = [8, 32], strides = [1, 1]} : vector<32x32xf32> to vector<8x32xf32>
    %cst_35 = arith.constant dense<0.000000e+00> : vector<16x32xf32>
    %119 = tpu.matmul %117, %118, %cst_35 {dimension_numbers = #tpu.dot_dimension_numbers<[1], [0], [0], [1], [0, 0, 1, 1], [], []>} : vector<16x8xf32>, vector<8x32xf32>, vector<16x32xf32> -> vector<16x32xf32>
    %120 = arith.addf %94, %119 : vector<16x32xf32>
    %121 = vector.broadcast %11 : vector<1x32xf32> to vector<16x32xf32>
    %122 = arith.addf %120, %121 : vector<16x32xf32>
    %123 = arith.addf %122, %0 : vector<16x32xf32>
    %cst_36 = arith.constant dense<0.000000e+00> : vector<16xf32>
    %124 = vector.multi_reduction <add>, %123, %cst_36 [1] : vector<16x32xf32> to vector<16xf32>
    %125 = vector.shape_cast %124 : vector<16xf32> to vector<16x1xf32>
    %cst_37 = arith.constant 3.200000e+01 : f32
    %126 = vector.broadcast %cst_37 : f32 to vector<16x1xf32>
    %127 = arith.divf %125, %126 : vector<16x1xf32>
    %128 = vector.broadcast %127 : vector<16x1xf32> to vector<16x32xf32>
    %129 = arith.subf %123, %128 : vector<16x32xf32>
    %130 = arith.mulf %129, %129 : vector<16x32xf32>
    %cst_38 = arith.constant dense<0.000000e+00> : vector<16xf32>
    %131 = vector.multi_reduction <add>, %130, %cst_38 [1] : vector<16x32xf32> to vector<16xf32>
    %132 = vector.shape_cast %131 : vector<16xf32> to vector<16x1xf32>
    %cst_39 = arith.constant 3.200000e+01 : f32
    %133 = vector.broadcast %cst_39 : f32 to vector<16x1xf32>
    %134 = arith.divf %132, %133 : vector<16x1xf32>
    %135 = vector.broadcast %127 : vector<16x1xf32> to vector<16x32xf32>
    %136 = arith.subf %123, %135 : vector<16x32xf32>
    %cst_40 = arith.constant 9.99999996E-13 : f32
    %137 = vector.broadcast %cst_40 : f32 to vector<16x1xf32>
    %138 = arith.addf %134, %137 : vector<16x1xf32>
    %139 = math.rsqrt %138 : vector<16x1xf32>
    %140 = vector.broadcast %139 : vector<16x1xf32> to vector<16x32xf32>
    %141 = arith.mulf %136, %140 : vector<16x32xf32>
    %142 = vector.broadcast %12 : vector<1x32xf32> to vector<16x32xf32>
    %143 = arith.mulf %141, %142 : vector<16x32xf32>
    %144 = vector.broadcast %13 : vector<1x32xf32> to vector<16x32xf32>
    %145 = arith.addf %143, %144 : vector<16x32xf32>
    %c0_41 = arith.constant 0 : index
    %c0_42 = arith.constant 0 : index
    %146 = vector.load %arg5[%c0_41, %c0_42] : memref<32x64xf32, #tpu.memory_space<vmem>>, vector<32x64xf32>
    %cst_43 = arith.constant dense<0.000000e+00> : vector<16x64xf32>
    %147 = tpu.matmul %145, %146, %cst_43 {dimension_numbers = #tpu.dot_dimension_numbers<[1], [0], [0], [1], [0, 0, 1, 1], [], []>} : vector<16x32xf32>, vector<32x64xf32>, vector<16x64xf32> -> vector<16x64xf32>
    %c0_44 = arith.constant 0 : index
    %c0_45 = arith.constant 0 : index
    %148 = vector.load %arg6[%c0_44, %c0_45] : memref<1x64xf32, #tpu.memory_space<vmem>>, vector<1x64xf32>
    %149 = vector.broadcast %148 : vector<1x64xf32> to vector<16x64xf32>
    %150 = arith.addf %147, %149 : vector<16x64xf32>
    %cst_46 = arith.constant 5.000000e-01 : f32
    %151 = vector.broadcast %cst_46 : f32 to vector<16x64xf32>
    %152 = arith.mulf %151, %150 : vector<16x64xf32>
    %cst_47 = arith.constant 0.707106769 : f32
    %153 = vector.broadcast %cst_47 : f32 to vector<16x64xf32>
    %154 = arith.mulf %150, %153 : vector<16x64xf32>
    %155 = math.erf %154 : vector<16x64xf32>
    %cst_48 = arith.constant 1.000000e+00 : f32
    %156 = vector.broadcast %cst_48 : f32 to vector<16x64xf32>
    %157 = arith.addf %156, %155 : vector<16x64xf32>
    %158 = arith.mulf %152, %157 : vector<16x64xf32>
    %c0_49 = arith.constant 0 : index
    %c0_50 = arith.constant 0 : index
    %159 = vector.load %arg7[%c0_49, %c0_50] : memref<64x32xf32, #tpu.memory_space<vmem>>, vector<64x32xf32>
    %cst_51 = arith.constant dense<0.000000e+00> : vector<16x32xf32>
    %160 = tpu.matmul %158, %159, %cst_51 {dimension_numbers = #tpu.dot_dimension_numbers<[1], [0], [0], [1], [0, 0, 1, 1], [], []>} : vector<16x64xf32>, vector<64x32xf32>, vector<16x32xf32> -> vector<16x32xf32>
    %161 = vector.broadcast %14 : vector<1x32xf32> to vector<16x32xf32>
    %162 = arith.addf %160, %161 : vector<16x32xf32>
    %163 = arith.addf %162, %145 : vector<16x32xf32>
    %cst_52 = arith.constant dense<0.000000e+00> : vector<16xf32>
    %164 = vector.multi_reduction <add>, %163, %cst_52 [1] : vector<16x32xf32> to vector<16xf32>
    %165 = vector.shape_cast %164 : vector<16xf32> to vector<16x1xf32>
    %cst_53 = arith.constant 3.200000e+01 : f32
    %166 = vector.broadcast %cst_53 : f32 to vector<16x1xf32>
    %167 = arith.divf %165, %166 : vector<16x1xf32>
    %168 = vector.broadcast %167 : vector<16x1xf32> to vector<16x32xf32>
    %169 = arith.subf %163, %168 : vector<16x32xf32>
    %170 = arith.mulf %169, %169 : vector<16x32xf32>
    %cst_54 = arith.constant dense<0.000000e+00> : vector<16xf32>
    %171 = vector.multi_reduction <add>, %170, %cst_54 [1] : vector<16x32xf32> to vector<16xf32>
    %172 = vector.shape_cast %171 : vector<16xf32> to vector<16x1xf32>
    %cst_55 = arith.constant 3.200000e+01 : f32
    %173 = vector.broadcast %cst_55 : f32 to vector<16x1xf32>
    %174 = arith.divf %172, %173 : vector<16x1xf32>
    %175 = vector.broadcast %167 : vector<16x1xf32> to vector<16x32xf32>
    %176 = arith.subf %163, %175 : vector<16x32xf32>
    %cst_56 = arith.constant 9.99999996E-13 : f32
    %177 = vector.broadcast %cst_56 : f32 to vector<16x1xf32>
    %178 = arith.addf %174, %177 : vector<16x1xf32>
    %179 = math.rsqrt %178 : vector<16x1xf32>
    %180 = vector.broadcast %179 : vector<16x1xf32> to vector<16x32xf32>
    %181 = arith.mulf %176, %180 : vector<16x32xf32>
    %182 = vector.broadcast %15 : vector<1x32xf32> to vector<16x32xf32>
    %183 = arith.mulf %181, %182 : vector<16x32xf32>
    %184 = vector.broadcast %16 : vector<1x32xf32> to vector<16x32xf32>
    %185 = arith.addf %183, %184 : vector<16x32xf32>
    %c0_57 = arith.constant 0 : index
    %c0_58 = arith.constant 0 : index
    %186 = vector.load %arg9[%c0_57, %c0_58] : memref<16x32xf32, #tpu.memory_space<vmem>>, vector<16x32xf32>
    tpu.vector_store %arg9[%c0_57, %c0_58], %185 {strides = array<i32>} : memref<16x32xf32, #tpu.memory_space<vmem>>, vector<16x32xf32>,
    return
  }
}

</mosaic_0001>

<bundles_post_ra>
// kernel: roberta_layer_forward.1
= control target key start
LH: loop header
LB: loop body
LE: loop exit
PB: predicated region body
PF: predicated region fallthrough
CT: control target
= control target key end

     0   :  { %s1489_s0 = inlined_call_operand.vmem [shape: f32[16,32], index: 0, kind: input, shape index: {}]   ;;  %s1490_s1 = inlined_call_operand.vmem [shape: f32[2,1,8], index: 1, kind: input, shape index: {}]   ;;  %s1491_s2 = inlined_call_operand.vmem [shape: f32[32,96], index: 2, kind: input, shape index: {}]   ;;  %s1492_s3 = inlined_call_operand.vmem [shape: f32[1,96], index: 3, kind: input, shape index: {}]   ;;  %s1493_s4 = inlined_call_operand.vmem [shape: f32[32,32], index: 4, kind: input, shape index: {}]   ;;  %s1494_s5 = inlined_call_operand.vmem [shape: f32[32,64], index: 5, kind: input, shape index: {}]   ;;  %s1495_s6 = inlined_call_operand.vmem [shape: f32[1,64], index: 6, kind: input, shape index: {}]   ;;  %s1496_s7 = inlined_call_operand.vmem [shape: f32[64,32], index: 7, kind: input, shape index: {}]   ;;  %s1497_s8 = inlined_call_operand.vmem [shape: f32[6,32], index: 8, kind: input, shape index: {}]   ;;  %s1498_s9 = inlined_call_operand.hbm [shape: f32[16,32], index: 9, kind: output, shape index: {}]  }
   0x1   :  { %v40_v0 = vld [vmem:[%s1491_s2 + $0x18] sm:$0xff]  ;;  %v39_v1 = vld [vmem:[%s1491_s2 + $0x10] sm:$0xff]  ;;  %v38_v2 = vld [vmem:[%s1491_s2 + $0x8] sm:$0xff] }
   0x2   :  { %64 = vmatpush.msra.mxu0 %v40_v0 }
   0x4   :  { %65 = vmatpush.msra.mxu0 %v39_v1 }
   0x5   :  { %14 = vsyncpa [#allocation3], 0  ;;  %v37_v3 = vld [vmem:[%s1491_s2] sm:$0xff]  ;;  %vm45_vm0 = vcmask 261120   ;;  %v1257_v5 = vld [vmem:[%s1489_s0 + $0x8] sm:$0xff]  ;;  %s1170_s22 = smov 88  }
   0x6   :  { %66 = vmatpush.msra.mxu0 %v38_v2  ;;  %v1250_v4 = vld [vmem:[%s1489_s0] sm:$0xff]  ;;  %s1171_s23 = smov 96   ;;  %s1172_s0 = smov 120   ;;  %vm83_vm1 = vcmask 64512   ;;  %v77_v1 = vld [vmem:[%s1493_s4 + $0x8] sm:$0xff]  ;;  %vm937_vm15 = vcmask 523264  }
   0x7   :  { %v1094_v6 = vld [vmem:[%s1492_s3] ss:$0 sm:$0xff]  ;;  %v1295_v25 = vld [vmem:[%s1490_s1 + $0x1] ss:$0 sm:$0xff]  ;;  %s1173_s27 = smov 64   ;;  %s1174_s28 = smov 80  }
   0x8   :  { %67 = vmatpush.msra.mxu0 %v37_v3  ;;  %v1286_v16 = vld [vmem:[%s1490_s1] ss:$0 sm:$0xff]  ;;  %s1175_s1 = smov 56   ;;  %s1176_s29 = smov 112  }
   0x9   :  { %1039 = vmatmul.msk.f32.vlgmr.msra.gmra.mxu0 %vm45_vm0, %v1250_v4  ;;  %s1177_s30 = smov 48   ;;  %s1178_s10 = smov 72   ;;  %v76_v0 = vld [vmem:[%s1493_s4] sm:$0xff] }
   0xa   :  { %s1179_s11 = smov 104   ;;  %s1180_s18 = smov 40  }
  0x11   :  { %1040 = vmatmul.msk.f32.gmra.mxu0 %vm45_vm0, %v1257_v5 }
  0x86   :  { %v69_v7 = vpop.f32.mrf.mxu0 }
  0x87   :  { %v1264_v8 = vadd.f32 %v1094_v6, %v69_v7 }
  0x89   :  { %221 = vrot.lane.b32.xlu1 %v1264_v8, %s1170_s22  ;;  %81 = vrot.lane.b32.xlu0 %v1264_v8, %s1171_s23 }
  0x8e   :  { %v72_v9 = vpop.f32.mrf.mxu0 }
  0x8f   :  { %v1268_v10 = vadd.f32 %v1094_v6, %v72_v9 }
  0x91   :  { %219 = vrot.lane.b32.xlu1 %v1264_v8, %s1172_s0  ;;  %109 = vrot.lane.b32.xlu0 %v1268_v10, %s1171_s23 }
  0x99   :  { %249 = vrot.lane.b32.xlu1 %v1268_v10, %s1170_s22  ;;  %s1184_s22 = smov 8  }
  0xfb   :  { %v222_v11 = vpop.permute.xlu1 %221  ;;  %v82_v12 = vpop.permute.xlu0 %81 }
  0xfc   :  { %1041 = vmatpush.xpose.msk.msrb.mxu0 %vm83_vm1, %v82_v12  ;;  %1047 = vmatpush.xpose.msk.msra.mxu1 %vm83_vm1, %v222_v11 }
  0xff   :  { %1042 = vmatmul.msk.f32.vlgmr.msrb.gmra.mxu0 %vm83_vm1, %v1264_v8 }
 0x100   :  { %403 = vmatpush.msra.mxu0 %v76_v0 }
 0x103   :  { %v220_v13 = vpop.permute.xlu1 %219  ;;  %v110_v14 = vpop.permute.xlu0 %109 }
 0x104   :  { %1043 = vmatpush.xpose.msk.msra.mxu2 %vm83_vm1, %v110_v14  ;;  %1048 = vmatmul.msk.f32.vlgmr.msra.gmra.mxu1 %vm83_vm1, %v220_v13 }
 0x107   :  { %1044 = vmatmul.msk.f32.vlgmr.msra.gmra.mxu2 %vm83_vm1, %v1268_v10 }
 0x10b   :  { %v250_v15 = vpop.permute.xlu1 %249 }
 0x10c   :  { %1049 = vmatpush.xpose.msk.msrb.mxu2 %vm83_vm1, %v250_v15 }
 0x110   :  { %374 = vmatpush.msra.mxu2 %v77_v1 }
 0x17c   :  { %v105_v17 = vpop.f32.mrf.mxu0 }
 0x17d   :  { %v135_v18 = vmul.f32 0.35355338, %v105_v17 }
 0x17f   :  { %v143_v19 = vadd.f32 %v1286_v16, %v135_v18 }
 0x181   :  { %v244_v20 = vpop.f32.mrf.mxu1  ;;  %v145_v21 = vsel %vm83_vm1, %v143_v19, -inf }
 0x182   :  { %v275_v22 = vmul.f32 0.35355338, %v244_v20  ;;  %146 = vmax.xlane.f32.xlu2 %v145_v21 }
 0x184   :  { %v277_v23 = vadd.f32 %v1286_v16, %v275_v22 }
 0x186   :  { %v279_v24 = vsel %vm83_vm1, %v277_v23, -inf }
 0x187   :  { %280 = vmax.xlane.f32.xlu0 %v279_v24 }
 0x18a   :  { %v132_v26 = vpop.f32.mrf.mxu2 }
 0x18b   :  { %v136_v27 = vmul.f32 0.35355338, %v132_v26 }
 0x18d   :  { %v144_v28 = vadd.f32 %v1295_v25, %v136_v27 }
 0x18f   :  { %v148_v29 = vsel %vm83_vm1, %v144_v28, -inf }
 0x190   :  { %149 = vmax.xlane.f32.xlu2 %v148_v29 }
 0x19b   :  { %193 = vrot.lane.b32.xlu0 %v1268_v10, %s1173_s27 }
 0x1a3   :  { %247 = vrot.lane.b32.xlu0 %v1268_v10, %s1172_s0 }
 0x1a8   :  { %167 = vrot.lane.b32.xlu2 %v1264_v8, %s1173_s27 }
 0x1ab   :  { %413 = vrot.lane.b32.xlu0 %v1264_v8, %s1174_s28 }
 0x1b3   :  { %441 = vrot.lane.b32.xlu0 %v1268_v10, %s1174_s28 }
 0x1f5   :  { %v147_v30 = vpop.xlane.xlu2 %146 }
 0x1f6   :  { %v151_v31 = vsub.f32 %v143_v19, %v147_v30 }
 0x1f8   :  { %v153_v32 = vmul.f32 1.442695, %v151_v31 }
 0x1fa   :  { %1098 = vpow2.f32 %v153_v32  ;;  %v281_v33 = vpop.xlane.xlu0 %280 }
 0x1fb   :  { %v285_v34 = vsub.f32 %v277_v23, %v281_v33 }
 0x1fd   :  { %v287_v35 = vmul.f32 1.442695, %v285_v34 }
 0x1ff   :  { %1100 = vpow2.f32 %v287_v35 }
 0x200   :  { %v1099_v36 = vpop.eup %1098 }
 0x201   :  { %v157_v37 = vsel %vm83_vm1, %v1099_v36, 0.0 }
 0x202   :  { %158 = vadd.xlane.f32.xlu1 %v157_v37 }
 0x203   :  { %v150_v38 = vpop.xlane.xlu2 %149 }
 0x204   :  { %v152_v39 = vsub.f32 %v144_v28, %v150_v38 }
 0x205   :  { %v1101_v40 = vpop.eup %1100 }
 0x206   :  { %v155_v41 = vmul.f32 1.442695, %v152_v39  ;;  %v291_v42 = vsel %vm83_vm1, %v1101_v40, 0.0 }
 0x207   :  { %292 = vadd.xlane.f32.xlu2 %v291_v42 }
 0x208   :  { %1102 = vpow2.f32 %v155_v41 }
 0x20b   :  { %v168_v43 = vpop.permute.xlu2 %167 }
 0x20c   :  { %188 = vmatpush.msra.mxu3 %v168_v43 }
 0x20d   :  { %v194_v44 = vpop.permute.xlu0 %193 }
 0x20e   :  { %v1103_v45 = vpop.eup %1102  ;;  %214 = vmatpush.msrb.mxu3 %v194_v44  ;;  %v78_v44 = vld [vmem:[%s1493_s4 + $0x10] sm:$0xff] }
 0x20f   :  { %v160_v46 = vsel %vm83_vm1, %v1103_v45, 0.0 }
 0x210   :  { %161 = vadd.xlane.f32.xlu2 %v160_v46 }
 0x215   :  { %v248_v47 = vpop.permute.xlu0 %247 }
 0x216   :  { %1050 = vmatmul.msk.f32.vlgmr.msrb.gmra.mxu2 %vm83_vm1, %v248_v47 }
 0x217   :  { %566 = vmatpush.msrb.mxu2 %v78_v44 }
 0x21b   :  { %301 = vrot.lane.b32.xlu1 %v1264_v8, %s1175_s1 }
 0x21d   :  { %v414_v56 = vpop.permute.xlu0 %413 }
 0x225   :  { %v442_v20 = vpop.permute.xlu0 %441 }
 0x228   :  { %411 = vrot.lane.b32.xlu2 %v1264_v8, %s1176_s29 }
 0x275   :  { %v159_v48 = vpop.xlane.xlu1 %158 }
 0x276   :  { %1104 = vrcp.f32 %v159_v48 }
 0x27a   :  { %v293_v49 = vpop.xlane.xlu2 %292 }
 0x27c   :  { %v1105_v50 = vpop.eup %1104 }
 0x27d   :  { %v165_v51 = vmul.f32 %v1105_v50, %v1099_v36 }
 0x27f   :  { %1045 = vmatmul.msk.f32.vlgmr.msra.gmra.mxu3 %vm83_vm1, %v165_v51 }
 0x283   :  { %v162_v52 = vpop.xlane.xlu2 %161 }
 0x284   :  { %1106 = vrcp.f32 %v162_v52 }
 0x285   :  { %1108 = vrcp.f32 %v293_v49 }
 0x28a   :  { %v1107_v53 = vpop.eup %1106 }
 0x28b   :  { %v166_v54 = vmul.f32 %v1107_v53, %v1103_v45  ;;  %v1109_v57 = vpop.eup %1108  ;;  %v412_v61 = vpop.permute.xlu2 %411 }
 0x28c   :  { %v299_v58 = vmul.f32 %v1109_v57, %v1101_v40 }
 0x28d   :  { %v302_v55 = vpop.permute.xlu1 %301  ;;  %1046 = vmatmul.msk.f32.vlgmr.msrb.gmra.mxu3 %vm83_vm1, %v166_v54 }
 0x28e   :  { %322 = vmatpush.msra.mxu3 %v302_v55 }
 0x290   :  { %1057 = vmatpush.xpose.msk.msrb.mxu3 %vm83_vm1, %v414_v56 }
 0x295   :  { %1051 = vmatmul.msk.f32.vlgmr.msra.gmra.mxu3 %vm83_vm1, %v299_v58 }
 0x299   :  { %v272_v59 = vpop.f32.mrf.mxu2 }
 0x29a   :  { %v276_v60 = vmul.f32 0.35355338, %v272_v59 }
 0x29c   :  { %v278_v62 = vadd.f32 %v1295_v25, %v276_v60 }
 0x29d   :  { %1058 = vmatmul.msk.f32.vlgmr.msrb.gmra.mxu3 %vm83_vm1, %v412_v61 }
 0x29e   :  { %v282_v63 = vsel %vm83_vm1, %v278_v62, -inf }
 0x29f   :  { %283 = vmax.xlane.f32.xlu1 %v282_v63 }
 0x2b8   :  { %327 = vrot.lane.b32.xlu1 %v1268_v10, %s1175_s1 }
 0x2c0   :  { %493 = vrot.lane.b32.xlu1 %v1264_v8, %s1177_s30 }
 0x2c8   :  { %606 = vrot.lane.b32.xlu1 %v1268_v10, %s1178_s10 }
 0x2d0   :  { %604 = vrot.lane.b32.xlu1 %v1268_v10, %s1179_s11 }
 0x302   :  { %v190_v2 = vpop.f32.mrf.mxu3 }
 0x303   :  { %1055 = vmatmul.msk.f32.vlgmr.msra.gmra.mxu0 %vm83_vm1, %v190_v2 }
 0x310   :  { %v216_v3 = vpop.f32.mrf.mxu3 }
 0x311   :  { %1056 = vmatmul.msk.f32.gmra.mxu0 %vm83_vm1, %v216_v3 }
 0x312   :  { %v284_v6 = vpop.xlane.xlu1 %283 }
 0x313   :  { %v286_v7 = vsub.f32 %v278_v62, %v284_v6 }
 0x315   :  { %v289_v9 = vmul.f32 1.442695, %v286_v7 }
 0x317   :  { %1110 = vpow2.f32 %v289_v9 }
 0x318   :  { %v324_v11 = vpop.f32.mrf.mxu3 }
 0x319   :  { %1053 = vmatmul.msk.f32.vlgmr.msra.gmra.mxu2 %vm83_vm1, %v324_v11 }
 0x31d   :  { %v1111_v12 = vpop.eup %1110 }
 0x31e   :  { %v294_v13 = vsel %vm83_vm1, %v1111_v12, 0.0 }
 0x31f   :  { %295 = vadd.xlane.f32.xlu2 %v294_v13 }
 0x320   :  { %v436_v14 = vpop.f32.mrf.mxu3 }
 0x321   :  { %v467_v15 = vmul.f32 0.35355338, %v436_v14 }
 0x323   :  { %v469_v17 = vadd.f32 %v1286_v16, %v467_v15 }
 0x325   :  { %v471_v18 = vsel %vm83_vm1, %v469_v17, -inf }
 0x326   :  { %472 = vmax.xlane.f32.xlu0 %v471_v18 }
 0x32a   :  { %v328_v19 = vpop.permute.xlu1 %327 }
 0x32b   :  { %348 = vmatpush.msrb.mxu1 %v328_v19 }
 0x32d   :  { %1059 = vmatpush.xpose.msk.msra.mxu1 %vm83_vm1, %v442_v20 }
 0x332   :  { %v494_v21 = vpop.permute.xlu1 %493 }
 0x333   :  { %514 = vmatpush.msra.mxu3 %v494_v21 }
 0x337   :  { %439 = vrot.lane.b32.xlu2 %v1268_v10, %s1176_s29 }
 0x33a   :  { %v607_v22 = vpop.permute.xlu1 %606  ;;  %578 = vrot.lane.b32.xlu0 %v1264_v8, %s1178_s10 }
 0x33b   :  { %1067 = vmatpush.xpose.msk.msrb.mxu3 %vm83_vm1, %v607_v22 }
 0x342   :  { %v605_v42 = vpop.permute.xlu1 %604 }
 0x380   :  { %v1359_v45 = vpop.f32.mrf.mxu0 }
 0x38e   :  { %v1361_v49 = vpop.f32.mrf.mxu0 }
 0x392   :  { %v296_v23 = vpop.xlane.xlu2 %295 }
 0x393   :  { %1112 = vrcp.f32 %v296_v23 }
 0x399   :  { %v1113_v24 = vpop.eup %1112  ;;  %v473_v26 = vpop.xlane.xlu0 %472 }
 0x39a   :  { %v477_v27 = vsub.f32 %v469_v17, %v473_v26  ;;  %v300_v28 = vmul.f32 %v1113_v24, %v1111_v12  ;;  %v440_v30 = vpop.permute.xlu2 %439 }
 0x39c   :  { %v479_v29 = vmul.f32 1.442695, %v477_v27  ;;  %1052 = vmatmul.msk.f32.vlgmr.msrb.gmra.mxu1 %vm83_vm1, %v300_v28  ;;  %v376_v24 = vpop.f32.mrf.mxu2  ;;  %v1387_v28 = vld [vmem:[%s1497_s8] sm:$0x3f]  ;;  %s1183_s8 = smov 128  }
 0x39e   :  { %1114 = vpow2.f32 %v479_v29  ;;  %v406_v29 = vadd.f32 %v1359_v45, %v376_v24  ;;  %v1181_v45 = vmov 32.0  }
 0x3a4   :  { %v1115_v31 = vpop.eup %1114  ;;  %1060 = vmatmul.msk.f32.vlgmr.msra.gmra.mxu1 %vm83_vm1, %v440_v30 }
 0x3a5   :  { %v483_v32 = vsel %vm83_vm1, %v1115_v31, 0.0 }
 0x3a6   :  { %484 = vadd.xlane.f32.xlu0 %v483_v32 }
 0x3ac   :  { %v579_v33 = vpop.permute.xlu0 %578 }
 0x3ad   :  { %1065 = vmatpush.xpose.msk.msrb.mxu0 %vm83_vm1, %v579_v33 }
 0x3ba   :  { %576 = vrot.lane.b32.xlu0 %v1264_v8, %s1179_s11 }
 0x419   :  { %v350_v34 = vpop.f32.mrf.mxu1  ;;  %v485_v35 = vpop.xlane.xlu0 %484 }
 0x41a   :  { %1116 = vrcp.f32 %v485_v35  ;;  %1054 = vmatmul.msk.f32.gmra.mxu2 %vm83_vm1, %v350_v34 }
 0x420   :  { %v1117_v36 = vpop.eup %1116 }
 0x421   :  { %v491_v37 = vmul.f32 %v1117_v36, %v1115_v31  ;;  %v464_v38 = vpop.f32.mrf.mxu1  ;;  %v741_v31 = vperm.slane %v1387_v28, 0 }
 0x422   :  { %v468_v39 = vmul.f32 0.35355338, %v464_v38 }
 0x423   :  { %1061 = vmatmul.msk.f32.vlgmr.msra.gmra.mxu3 %vm83_vm1, %v491_v37 }
 0x424   :  { %v470_v40 = vadd.f32 %v1295_v25, %v468_v39 }
 0x426   :  { %v474_v41 = vsel %vm83_vm1, %v470_v40, -inf }
 0x427   :  { %475 = vmax.xlane.f32.xlu2 %v474_v41 }
 0x42b   :  { %1068 = vmatmul.msk.f32.vlgmr.msrb.gmra.mxu3 %vm83_vm1, %v605_v42 }
 0x42c   :  { %v577_v43 = vpop.permute.xlu0 %576 }
 0x42d   :  { %1066 = vmatmul.msk.f32.vlgmr.msrb.gmra.mxu0 %vm83_vm1, %v577_v43 }
 0x49a   :  { %v476_v46 = vpop.xlane.xlu2 %475 }
 0x49b   :  { %v478_v47 = vsub.f32 %v470_v40, %v476_v46 }
 0x49d   :  { %v481_v48 = vmul.f32 1.442695, %v478_v47  ;;  %v379_v26 = vpop.f32.mrf.mxu2 }
 0x49e   :  { %v409_v36 = vadd.f32 %v1361_v49, %v379_v26 }
 0x49f   :  { %1118 = vpow2.f32 %v481_v48 }
 0x4a5   :  { %v1119_v50 = vpop.eup %1118 }
 0x4a6   :  { %v516_v51 = vpop.f32.mrf.mxu3  ;;  %v486_v52 = vsel %vm83_vm1, %v1119_v50, 0.0 }
 0x4a7   :  { %487 = vadd.xlane.f32.xlu2 %v486_v52  ;;  %1063 = vmatmul.msk.f32.vlgmr.msrb.gmra.mxu2 %vm83_vm1, %v516_v51 }
 0x4aa   :  { %v601_v53 = vpop.f32.mrf.mxu0 }
 0x4ab   :  { %v632_v54 = vmul.f32 0.35355338, %v601_v53 }
 0x4ad   :  { %v634_v55 = vadd.f32 %v1286_v16, %v632_v54 }
 0x4ae   :  { %v629_v56 = vpop.f32.mrf.mxu3 }
 0x4af   :  { %v633_v57 = vmul.f32 0.35355338, %v629_v56  ;;  %v636_v58 = vsel %vm83_vm1, %v634_v55, -inf }
 0x4b0   :  { %637 = vmax.xlane.f32.xlu0 %v636_v58 }
 0x4b1   :  { %v635_v59 = vadd.f32 %v1295_v25, %v633_v57 }
 0x4b3   :  { %v639_v60 = vsel %vm83_vm1, %v635_v59, -inf }
 0x4b4   :  { %640 = vmax.xlane.f32.xlu1 %v639_v60  ;;  %v806_v60 = vld [vmem:[%s1494_s5 + $0x18] sm:$0xff] }
 0x4cd   :  { %519 = vrot.lane.b32.xlu1 %v1268_v10, %s1177_s30 }
 0x51a   :  { %v488_v25 = vpop.xlane.xlu2 %487 }
 0x523   :  { %v638_v61 = vpop.xlane.xlu0 %637 }
 0x524   :  { %v642_v62 = vsub.f32 %v634_v55, %v638_v61  ;;  %v805_v61 = vld [vmem:[%s1494_s5 + $0x10] sm:$0xff] }
 0x526   :  { %v644_v63 = vmul.f32 1.442695, %v642_v62  ;;  %v804_v62 = vld [vmem:[%s1494_s5 + $0x8] sm:$0xff] }
 0x527   :  { %v641_v0 = vpop.xlane.xlu1 %640 }
 0x528   :  { %1120 = vpow2.f32 %v644_v63  ;;  %v643_v1 = vsub.f32 %v635_v59, %v641_v0  ;;  %v803_v63 = vld [vmem:[%s1494_s5] sm:$0xff] }
 0x52a   :  { %v646_v16 = vmul.f32 1.442695, %v643_v1  ;;  %v568_v27 = vpop.f32.mrf.mxu2 }
 0x52b   :  { %v574_v30 = vadd.f32 %v568_v27, %v406_v29 }
 0x52c   :  { %1122 = vpow2.f32 %v646_v16 }
 0x52d   :  { %1124 = vrcp.f32 %v488_v25 }
 0x52e   :  { %v1121_v2 = vpop.eup %1120 }
 0x52f   :  { %v648_v3 = vsel %vm83_vm1, %v1121_v2, 0.0 }
 0x530   :  { %649 = vadd.xlane.f32.xlu0 %v648_v3 }
 0x532   :  { %v1123_v6 = vpop.eup %1122 }
 0x533   :  { %v651_v7 = vsel %vm83_vm1, %v1123_v6, 0.0  ;;  %v1125_v9 = vpop.eup %1124 }
 0x534   :  { %652 = vadd.xlane.f32.xlu2 %v651_v7  ;;  %v492_v11 = vmul.f32 %v1125_v9, %v1119_v50 }
 0x53f   :  { %v520_v12 = vpop.permute.xlu1 %519 }
 0x540   :  { %540 = vmatpush.msrb.mxu1 %v520_v12 }
 0x541   :  { %1062 = vmatmul.msk.f32.vlgmr.msrb.gmra.mxu1 %vm83_vm1, %v492_v11 }
 0x544   :  { %658 = vrot.lane.b32.xlu0 %v1264_v8, %s1180_s18  ;;  %v79_v8 = vld [vmem:[%s1493_s4 + $0x18] sm:$0xff]  ;;  %s1027_s4 = sshll.u32 %s1498_s9, 4  ;;  %s1028_s4 = int_to_ptr.hbm [resolvable:$true] %s1027_s4 }
 0x545   :  { %731 = vmatpush.msra.mxu3 %v79_v8 }
 0x54c   :  { %684 = vrot.lane.b32.xlu2 %v1268_v10, %s1180_s18 }
 0x5a3   :  { %v650_v14 = vpop.xlane.xlu0 %649 }
 0x5a7   :  { %v653_v13 = vpop.xlane.xlu2 %652 }
 0x5a8   :  { %1126 = vrcp.f32 %v653_v13 }
 0x5a9   :  { %1128 = vrcp.f32 %v650_v14 }
 0x5aa   :  { %1130 = vrcp.f32 %v1181_v45 }
 0x5ae   :  { %v1127_v15 = vpop.eup %1126 }
 0x5af   :  { %v657_v17 = vmul.f32 %v1127_v15, %v1123_v6  ;;  %v685_v18 = vpop.permute.xlu2 %684  ;;  %v1129_v19 = vpop.eup %1128 }
 0x5b0   :  { %705 = vmatpush.msra.mxu0 %v685_v18  ;;  %v656_v20 = vmul.f32 %v1129_v19, %v1121_v2  ;;  %v1131_v46 = vpop.eup %1130 }
 0x5b1   :  { %1070 = vmatmul.msk.f32.vlgmr.msra.gmra.mxu0 %vm83_vm1, %v657_v17  ;;  %v753_v47 = vmul.f32 32.0, %v1131_v46  ;;  %vm757_vm2 = vweird.f32 %v1131_v46  ;;  %v797_v17 = vperm.slane %v1387_v28, 1 }
 0x5b3   :  { %v754_v48 = vsub.f32 1.0, %v753_v47 }
 0x5b5   :  { %v755_v49 = vmul.f32 %v1131_v46, %v754_v48 }
 0x5b6   :  { %v659_v21 = vpop.permute.xlu0 %658 }
 0x5b7   :  { %679 = vmatpush.msra.mxu1 %v659_v21  ;;  %v756_v50 = vadd.f32 %v1131_v46, %v755_v49  ;;  %v800_v21 = vperm.slane %v1387_v28, 2 }
 0x5b8   :  { %1069 = vmatmul.msk.f32.vlgmr.msra.gmra.mxu1 %vm83_vm1, %v656_v20 }
 0x5b9   :  { %829 = vmatpush.msrb.mxu1 %v806_v60 }
 0x5bb   :  { %830 = vmatpush.msrb.mxu1 %v805_v61 }
 0x5bd   :  { %831 = vmatpush.msrb.mxu1 %v804_v62  ;;  %v929_v62 = vld [vmem:[%s1496_s7 + $0x8] sm:$0xff] }
 0x5be   :  { %v542_v22 = vpop.f32.mrf.mxu1 }
 0x5bf   :  { %1064 = vmatmul.msk.f32.gmra.mxu2 %vm83_vm1, %v542_v22  ;;  %832 = vmatpush.msrb.mxu1 %v803_v63 }
 0x62e   :  { %v707_v23 = vpop.f32.mrf.mxu0 }
 0x635   :  { %v681_v10 = vpop.f32.mrf.mxu1 }
 0x636   :  { %1071 = vmatmul.msk.f32.vlgmr.msra.gmra.mxu3 %vm83_vm1, %v681_v10 }
 0x63e   :  { %1072 = vmatmul.msk.f32.gmra.mxu3 %vm83_vm1, %v707_v23 }
 0x642   :  { %v571_v35 = vpop.f32.mrf.mxu2 }
 0x643   :  { %v575_v38 = vadd.f32 %v571_v35, %v409_v36 }
 0x6b9   :  { %v733_v32 = vpop.f32.mrf.mxu3 }
 0x6ba   :  { %v739_v33 = vadd.f32 %v733_v32, %v574_v30 }
 0x6bc   :  { %v742_v34 = vadd.f32 %v741_v31, %v739_v33 }
 0x6be   :  { %v744_v37 = vadd.f32 %v742_v34, %v1250_v4  ;;  %v1396_v4 = vsel %vm757_vm2, %v1131_v46, %v756_v50  ;;  %v933_v46 = vld [vmem:[%s1496_s7 + $0x28] sm:$0xff]  ;;  %v932_v50 = vld [vmem:[%s1496_s7 + $0x20] sm:$0xff] }
 0x6c0   :  { %v746_v39 = vsel %vm45_vm0, %v744_v37, 0.0 }
 0x6c1   :  { %747 = vadd.xlane.f32.xlu1 %v746_v39  ;;  %v736_v40 = vpop.f32.mrf.mxu3 }
 0x6c2   :  { %v740_v41 = vadd.f32 %v736_v40, %v575_v38  ;;  %v935_v38 = vld [vmem:[%s1496_s7 + $0x38] sm:$0xff] }
 0x6c3   :  { %952 = vmatpush.msra.mxu2 %v935_v38 }
 0x6c4   :  { %v743_v42 = vadd.f32 %v741_v31, %v740_v41  ;;  %v1097_v31 = vld [vmem:[%s1495_s6] ss:$0 sm:$0xff] }
 0x6c6   :  { %v745_v43 = vadd.f32 %v743_v42, %v1257_v5  ;;  %v934_v42 = vld [vmem:[%s1496_s7 + $0x30] sm:$0xff] }
 0x6c7   :  { %953 = vmatpush.msra.mxu2 %v934_v42 }
 0x6c8   :  { %v749_v44 = vsel %vm45_vm0, %v745_v43, 0.0 }
 0x6c9   :  { %750 = vadd.xlane.f32.xlu0 %v749_v44  ;;  %954 = vmatpush.msra.mxu2 %v933_v46 }
 0x6cb   :  { %955 = vmatpush.msra.mxu2 %v932_v50 }
 0x734   :  { %v748_v51 = vpop.xlane.xlu1 %747 }
 0x735   :  { %v759_v52 = vmul.f32 %v1396_v4, %v748_v51 }
 0x737   :  { %v761_v53 = vsub.f32 %v744_v37, %v759_v52 }
 0x739   :  { %v763_v54 = vmul.f32 %v761_v53, %v761_v53 }
 0x73b   :  { %v765_v5 = vsel %vm45_vm0, %v763_v54, 0.0  ;;  %v931_v54 = vld [vmem:[%s1496_s7 + $0x18] sm:$0xff] }
 0x73c   :  { %766 = vadd.xlane.f32.xlu2 %v765_v5  ;;  %v751_v55 = vpop.xlane.xlu0 %750  ;;  %956 = vmatpush.msra.mxu2 %v931_v54 }
 0x73d   :  { %v760_v56 = vmul.f32 %v1396_v4, %v751_v55 }
 0x73f   :  { %v762_v57 = vsub.f32 %v745_v43, %v760_v56 }
 0x741   :  { %v764_v58 = vmul.f32 %v762_v57, %v762_v57 }
 0x743   :  { %v768_v59 = vsel %vm45_vm0, %v764_v58, 0.0 }
 0x744   :  { %769 = vadd.xlane.f32.xlu1 %v768_v59 }
 0x7af   :  { %v767_v0 = vpop.xlane.xlu2 %766 }
 0x7b0   :  { %v771_v1 = vmul.f32 %v767_v0, %v1396_v4 }
 0x7b2   :  { %v773_v16 = vadd.f32 1e-12, %v771_v1 }
 0x7b4   :  { %1132 = vrsqrt.f32 %v773_v16  ;;  %vm781_vm4 = vweird.f32 %v773_v16 }
 0x7b7   :  { %v770_v2 = vpop.xlane.xlu1 %769 }
 0x7b8   :  { %v772_v3 = vmul.f32 %v770_v2, %v1396_v4 }
 0x7ba   :  { %v1133_v6 = vpop.eup %1132  ;;  %v774_v25 = vadd.f32 1e-12, %v772_v3 }
 0x7bb   :  { %v776_v7 = vmul.f32 %v1133_v6, %v773_v16  ;;  %vm782_vm3 = vweird.f32 %v1133_v6  ;;  %v928_v16 = vld [vmem:[%s1496_s7] sm:$0xff] }
 0x7bc   :  { %1134 = vrsqrt.f32 %v774_v25  ;;  %vm783_vm5 = vmor %vm781_vm4, %vm782_vm3  ;;  %vm791_vm7 = vweird.f32 %v774_v25 }
 0x7bd   :  { %v777_v9 = vmul.f32 %v1133_v6, %v776_v7 }
 0x7bf   :  { %v778_v11 = vmul.f32 0.5, %v777_v9 }
 0x7c1   :  { %v779_v12 = vsub.f32 1.5, %v778_v11 }
 0x7c2   :  { %v1135_v13 = vpop.eup %1134 }
 0x7c3   :  { %v780_v14 = vmul.f32 %v1133_v6, %v779_v12  ;;  %v786_v15 = vmul.f32 %v1135_v13, %v774_v25  ;;  %vm792_vm6 = vweird.f32 %v1135_v13 }
 0x7c4   :  { %vm793_vm8 = vmor %vm791_vm7, %vm792_vm6 }
 0x7c5   :  { %v784_v18 = vsel %vm783_vm5, %v1133_v6, %v780_v14  ;;  %v787_v19 = vmul.f32 %v1135_v13, %v786_v15 }
 0x7c6   :  { %v795_v20 = vmul.f32 %v784_v18, %v761_v53 }
 0x7c7   :  { %v788_v22 = vmul.f32 0.5, %v787_v19 }
 0x7c8   :  { %v798_v8 = vmul.f32 %v797_v17, %v795_v20 }
 0x7c9   :  { %v789_v10 = vsub.f32 1.5, %v788_v22 }
 0x7ca   :  { %v1418_v23 = vadd.f32 %v800_v21, %v798_v8 }
 0x7cb   :  { %v790_v24 = vmul.f32 %v1135_v13, %v789_v10 }
 0x7cc   :  { %1073 = vmatmul.msk.f32.vlgmr.msrb.gmra.mxu1 %vm45_vm0, %v1418_v23 }
 0x7cd   :  { %v794_v26 = vsel %vm793_vm8, %v1135_v13, %v790_v24 }
 0x7ce   :  { %v796_v27 = vmul.f32 %v794_v26, %v762_v57  ;;  %v930_v57 = vld [vmem:[%s1496_s7 + $0x10] sm:$0xff]  ;;  %s1182_s7 = smov [#allocation2]  }
 0x7cf   :  { %957 = vmatpush.msra.mxu2 %v930_v57  ;;  %s1025_s20 = sshll.u32 %s1182_s7, 4  ;;  %s1026_s20 = int_to_ptr.vmem [resolvable:$true] %s1025_s20 }
 0x7d0   :  { %v799_v29 = vmul.f32 %v797_v17, %v796_v27 }
 0x7d1   :  { %958 = vmatpush.msra.mxu2 %v929_v62 }
 0x7d2   :  { %v1422_v30 = vadd.f32 %v800_v21, %v799_v29 }
 0x7d3   :  { %959 = vmatpush.msra.mxu2 %v928_v16 }
 0x7d4   :  { %1074 = vmatmul.msk.f32.gmra.mxu1 %vm45_vm0, %v1422_v30 }
 0x849   :  { %v834_v32 = vpop.f32.mrf.mxu1 }
 0x84a   :  { %v1429_v33 = vadd.f32 %v1097_v31, %v834_v32 }
 0x84c   :  { %v1432_v34 = vmul.f32 0.70710677, %v1429_v33  ;;  %v840_v54 = vmul.f32 0.5, %v1429_v33  ;;  %v936_v33 = vperm.slane %v1387_v28, 3 }
 0x84e   :  { %v844_v35 = vmul.f32 %v1432_v34, %v1432_v34 }
 0x850   :  { %v845_v36 = vmin.f32 %v844_v35, 16.0 }
 0x851   :  { %v837_v37 = vpop.f32.mrf.mxu1 }
 0x852   :  { %v846_v39 = vmul.f32 2.1237322e-06, %v845_v36  ;;  %v857_v40 = vmul.f32 3.8918573e-05, %v845_v36  ;;  %v1439_v41 = vadd.f32 %v1097_v31, %v837_v37 }
 0x854   :  { %v847_v43 = vadd.f32 0.00028619796, %v846_v39  ;;  %v858_v44 = vadd.f32 0.001143296, %v857_v40  ;;  %v1445_v45 = vmul.f32 0.70710677, %v1439_v41 }
 0x856   :  { %v848_v47 = vmul.f32 %v847_v43, %v845_v36  ;;  %v859_v48 = vmul.f32 %v858_v44, %v845_v36  ;;  %v884_v49 = vmul.f32 %v1445_v45, %v1445_v45 }
 0x858   :  { %v860_v51 = vadd.f32 0.014752088, %v859_v48  ;;  %v849_v52 = vadd.f32 0.0036580483, %v848_v47  ;;  %v885_v53 = vmin.f32 %v884_v49, 16.0 }
 0x85a   :  { %v861_v5 = vmul.f32 %v860_v51, %v845_v36  ;;  %v886_v55 = vmul.f32 2.1237322e-06, %v885_v53  ;;  %v897_v56 = vmul.f32 3.8918573e-05, %v885_v53  ;;  %v850_v59 = vmul.f32 %v849_v52, %v845_v36 }
 0x85c   :  { %v862_v58 = vadd.f32 0.112945676, %v861_v5  ;;  %v887_v60 = vadd.f32 0.00028619796, %v886_v55  ;;  %v898_v61 = vadd.f32 0.001143296, %v897_v56 }
 0x85d   :  { %v851_v3 = vadd.f32 0.05243302, %v850_v59 }
 0x85e   :  { %v863_v63 = vmul.f32 %v862_v58, %v845_v36  ;;  %v888_v0 = vmul.f32 %v887_v60, %v885_v53  ;;  %v899_v1 = vmul.f32 %v898_v61, %v885_v53  ;;  %v841_v61 = vmul.f32 0.5, %v1439_v41 }
 0x85f   :  { %v852_v12 = vmul.f32 %v851_v3, %v845_v36 }
 0x860   :  { %v864_v2 = vadd.f32 0.4994258, %v863_v63  ;;  %v900_v6 = vadd.f32 0.014752088, %v899_v1  ;;  %v889_v7 = vadd.f32 0.0036580483, %v888_v0 }
 0x861   :  { %v853_v17 = vadd.f32 0.18741608, %v852_v12 }
 0x862   :  { %v865_v25 = vmul.f32 %v864_v2, %v845_v36  ;;  %v901_v9 = vmul.f32 %v900_v6, %v885_v53  ;;  %v890_v14 = vmul.f32 %v889_v7, %v885_v53 }
 0x863   :  { %v854_v22 = vmul.f32 %v853_v17, %v845_v36 }
 0x864   :  { %v866_v11 = vadd.f32 1.0, %v865_v25  ;;  %v902_v13 = vadd.f32 0.112945676, %v901_v9  ;;  %v891_v19 = vadd.f32 0.05243302, %v890_v14 }
 0x865   :  { %v855_v29 = vadd.f32 1.1283791, %v854_v22 }
 0x866   :  { %1136 = vrcp.f32 %v866_v11  ;;  %v903_v15 = vmul.f32 %v902_v13, %v885_v53  ;;  %v892_v24 = vmul.f32 %v891_v19, %v885_v53  ;;  %v878_v27 = vand.u32 2147483648, %v866_v11 }
 0x867   :  { %v876_v32 = vand.u32 2147483647, %v866_v11  ;;  %vm872_vm10 = vweird.f32 %v866_v11  ;;  %v856_v40 = vmul.f32 %v855_v29, %v1432_v34 }
 0x868   :  { %v904_v18 = vadd.f32 0.4994258, %v903_v15  ;;  %v893_v35 = vadd.f32 0.18741608, %v892_v24  ;;  %v879_v38 = vor.u32 1.1754944e-38, %v878_v27 }
 0x869   :  { %vm877_vm12 = vcmp.eq.f32.partialorder %v876_v32, 8.507059e+37  ;;  %v1013_v32 = vperm.slane %v1387_v28, 4 }
 0x86a   :  { %v905_v20 = vmul.f32 %v904_v18, %v885_v53  ;;  %v894_v43 = vmul.f32 %v893_v35, %v885_v53 }
 0x86c   :  { %v1137_v21 = vpop.eup %1136  ;;  %v906_v10 = vadd.f32 1.0, %v905_v20  ;;  %v895_v50 = vadd.f32 1.1283791, %v894_v43 }
 0x86d   :  { %v868_v8 = vmul.f32 %v1137_v21, %v866_v11  ;;  %vm873_vm9 = vweird.f32 %v1137_v21 }
 0x86e   :  { %1138 = vrcp.f32 %v906_v10  ;;  %vm874_vm11 = vmor %vm872_vm10, %vm873_vm9  ;;  %v918_v49 = vand.u32 2147483648, %v906_v10  ;;  %v916_v52 = vand.u32 2147483647, %v906_v10  ;;  %vm912_vm14 = vweird.f32 %v906_v10 }
 0x86f   :  { %v869_v26 = vsub.f32 1.0, %v868_v8  ;;  %v896_v53 = vmul.f32 %v895_v50, %v1445_v45 }
 0x870   :  { %v919_v56 = vor.u32 1.1754944e-38, %v918_v49  ;;  %vm917_vm2 = vcmp.eq.f32.partialorder %v916_v52, 8.507059e+37 }
 0x871   :  { %v870_v31 = vmul.f32 %v1137_v21, %v869_v26 }
 0x873   :  { %v871_v37 = vadd.f32 %v1137_v21, %v870_v31 }
 0x874   :  { %v1139_v39 = vpop.eup %1138 }
 0x875   :  { %v875_v42 = vsel %vm874_vm11, %v1137_v21, %v871_v37  ;;  %v908_v44 = vmul.f32 %v1139_v39, %v906_v10  ;;  %vm913_vm13 = vweird.f32 %v1139_v39 }
 0x876   :  { %v880_v36 = vsel %vm877_vm12, %v879_v38, %v875_v42  ;;  %vm914_vm1 = vmor %vm912_vm14, %vm913_vm13 }
 0x877   :  { %v881_v46 = vmul.f32 %v880_v36, %v856_v40  ;;  %v909_v47 = vsub.f32 1.0, %v908_v44 }
 0x879   :  { %v1075_v48 = vclamps-f32 %v881_v46, 1.0  ;;  %v910_v51 = vmul.f32 %v1139_v39, %v909_v47 }
 0x87b   :  { %v924_v5 = vadd.f32 1.0, %v1075_v48  ;;  %v911_v55 = vadd.f32 %v1139_v39, %v910_v51 }
 0x87d   :  { %v926_v34 = vmul.f32 %v924_v5, %v840_v54  ;;  %v915_v57 = vsel %vm914_vm1, %v1139_v39, %v911_v55 }
 0x87e   :  { %v920_v58 = vsel %vm917_vm2, %v919_v56, %v915_v57 }
 0x87f   :  { %1077 = vmatmul.msk.f32.vlgmr.msra.gmra.mxu2 %vm937_vm15, %v926_v34  ;;  %v921_v59 = vmul.f32 %v920_v58, %v896_v53 }
 0x881   :  { %v1076_v60 = vclamps-f32 %v921_v59, 1.0 }
 0x883   :  { %v925_v62 = vadd.f32 1.0, %v1076_v60 }
 0x885   :  { %v927_v63 = vmul.f32 %v925_v62, %v841_v61 }
 0x887   :  { %1078 = vmatmul.msk.f32.gmra.mxu2 %vm937_vm15, %v927_v63 }
 0x902   :  { %v961_v0 = vpop.f32.mrf.mxu2 }
 0x903   :  { %v962_v1 = vadd.f32 %v961_v0, %v936_v33 }
 0x905   :  { %v967_v16 = vadd.f32 %v962_v1, %v1418_v23 }
 0x907   :  { %v969_v2 = vsel %vm45_vm0, %v967_v16, 0.0 }
 0x908   :  { %970 = vadd.xlane.f32.xlu0 %v969_v2 }
 0x90a   :  { %v964_v45 = vpop.f32.mrf.mxu2 }
 0x90b   :  { %v965_v3 = vadd.f32 %v964_v45, %v936_v33 }
 0x90d   :  { %v968_v6 = vadd.f32 %v965_v3, %v1422_v30 }
 0x90f   :  { %v972_v25 = vsel %vm45_vm0, %v968_v6, 0.0 }
 0x910   :  { %973 = vadd.xlane.f32.xlu1 %v972_v25 }
 0x97b   :  { %v971_v41 = vpop.xlane.xlu0 %970 }
 0x97c   :  { %v975_v7 = vmul.f32 %v971_v41, %v1396_v4 }
 0x97e   :  { %v977_v9 = vsub.f32 %v967_v16, %v975_v7 }
 0x980   :  { %v979_v11 = vmul.f32 %v977_v9, %v977_v9 }
 0x982   :  { %v981_v12 = vsel %vm45_vm0, %v979_v11, 0.0 }
 0x983   :  { %982 = vadd.xlane.f32.xlu0 %v981_v12  ;;  %v974_v13 = vpop.xlane.xlu1 %973 }
 0x984   :  { %v976_v23 = vmul.f32 %v974_v13, %v1396_v4 }
 0x986   :  { %v978_v14 = vsub.f32 %v968_v6, %v976_v23 }
 0x988   :  { %v980_v15 = vmul.f32 %v978_v14, %v978_v14 }
 0x98a   :  { %v984_v17 = vsel %vm45_vm0, %v980_v15, 0.0 }
 0x98b   :  { %985 = vadd.xlane.f32.xlu2 %v984_v17 }
 0x9f6   :  { %v983_v30 = vpop.xlane.xlu0 %982 }
 0x9f7   :  { %v987_v18 = vmul.f32 %v983_v30, %v1396_v4 }
 0x9f9   :  { %v989_v19 = vadd.f32 1e-12, %v987_v18 }
 0x9fb   :  { %1140 = vrsqrt.f32 %v989_v19  ;;  %vm997_vm4 = vweird.f32 %v989_v19 }
 0x9fe   :  { %v986_v20 = vpop.xlane.xlu2 %985 }
 0x9ff   :  { %v988_v21 = vmul.f32 %v986_v20, %v1396_v4  ;;  %v1016_v4 = vperm.slane %v1387_v28, 5 }
 0xa01   :  { %v1141_v22 = vpop.eup %1140  ;;  %v990_v10 = vadd.f32 1e-12, %v988_v21 }
 0xa02   :  { %v992_v8 = vmul.f32 %v1141_v22, %v989_v19  ;;  %vm998_vm3 = vweird.f32 %v1141_v22 }
 0xa03   :  { %1142 = vrsqrt.f32 %v990_v10  ;;  %vm999_vm5 = vmor %vm997_vm4, %vm998_vm3  ;;  %vm1007_vm7 = vweird.f32 %v990_v10 }
 0xa04   :  { %v993_v24 = vmul.f32 %v1141_v22, %v992_v8 }
 0xa06   :  { %v994_v26 = vmul.f32 0.5, %v993_v24 }
 0xa08   :  { %v995_v27 = vsub.f32 1.5, %v994_v26 }
 0xa09   :  { %v1143_v29 = vpop.eup %1142 }
 0xa0a   :  { %v996_v31 = vmul.f32 %v1141_v22, %v995_v27  ;;  %v1002_v35 = vmul.f32 %v1143_v29, %v990_v10  ;;  %vm1008_vm6 = vweird.f32 %v1143_v29 }
 0xa0b   :  { %vm1009_vm8 = vmor %vm1007_vm7, %vm1008_vm6 }
 0xa0c   :  { %v1000_v37 = vsel %vm999_vm5, %v1141_v22, %v996_v31  ;;  %v1003_v39 = vmul.f32 %v1143_v29, %v1002_v35 }
 0xa0d   :  { %v1011_v38 = vmul.f32 %v1000_v37, %v977_v9 }
 0xa0e   :  { %v1004_v42 = vmul.f32 0.5, %v1003_v39 }
 0xa0f   :  { %v1014_v40 = vmul.f32 %v1013_v32, %v1011_v38 }
 0xa10   :  { %v1005_v36 = vsub.f32 1.5, %v1004_v42 }
 0xa11   :  { %v1017_v43 = vadd.f32 %v1016_v4, %v1014_v40 }
 0xa12   :  { %v1006_v44 = vmul.f32 %v1143_v29, %v1005_v36 }
 0xa13   :  { %1019 = vst.msk [vmem:[#allocation2] sm:$0xff] %vm45_vm0, %v1017_v43 }
 0xa14   :  { %v1010_v46 = vsel %vm1009_vm8, %v1143_v29, %v1006_v44 }
 0xa15   :  { %v1012_v47 = vmul.f32 %v1010_v46, %v978_v14 }
 0xa17   :  { %v1015_v48 = vmul.f32 %v1013_v32, %v1012_v47 }
 0xa19   :  { %v1018_v28 = vadd.f32 %v1016_v4, %v1015_v48 }
 0xa1b   :  { %1020 = vst.msk [vmem:[#allocation2 + $0x8] sm:$0xff] %vm45_vm0, %v1018_v28 }
 0xa1c   :  { %1033 = dma.vmem_to_hbm [thread:$0]  %s1026_s20, 256, %s1028_s4, [#allocation3], %s1183_s8, %s1183_s8, %s1184_s22  }
 0xa1d   :  { %1168 = dma.done.wait [#allocation3], 256  }
 0xa1e   :  { %1169 = vsyncadd [#allocation3], 4294967040 }
 0xa1f   :  { %1038 = vsyncpa [#allocation3], 1 }

</bundles_post_ra>
